<compile_context>
chip_gen: v7x
topology: tpu7x:2x2x1
jax: 0.10.0
libtpu: 0.0.40
codegen_flags: <defaults>
</compile_context>

<pallas_src>
import jax
import jax.numpy as jnp
from jax import lax
from jax.experimental import pallas as pl
from jax.experimental.pallas import tpu as pltpu

EPS = 1e-8          # torch.nn.functional.cosine_similarity default eps
_OUT_LANES = 128    # lane-dense output block width


def _round_up(x, m):
    return (x + m - 1) // m * m


def _select_caps():
    """(row-tile cap, reduction-tile cap, vmem_limit_bytes) per generation."""
    vmem_bytes = 64 * 1024 * 1024          # conservative default (v7x per-TC)
    try:
        vmem_bytes = getattr(pltpu.get_tpu_info(), "vmem_capacity_bytes",
                             vmem_bytes)
    except Exception:
        pass
    if vmem_bytes >= 128 * 1024 * 1024:    # v5e / v6e: 128 MiB VMEM
        return 256, 4096, 64 * 1024 * 1024
    return 256, 2048, 32 * 1024 * 1024     # v7x: 64 MiB per TensorCore


def _make_kernel(tk, d, nk):
    """Build the kernel for a (row tiles, nk reduction tiles) grid."""
    n_strips = tk // 128
    rem = d - (nk - 1) * tk        # valid columns in the last K block, (0, tk]
    tail_full = rem // 128         # unmasked 128-lane strips in the last block
    tail_part = rem % 128          # valid lanes of the single masked strip

    def kernel(s_ref, b_ref, o_ref, dot_acc, nx_acc, ny_acc):
        k = pl.program_id(1)

        @pl.when(k == 0)
        def _init():
            dot_acc[...] = jnp.zeros_like(dot_acc)
            nx_acc[...] = jnp.zeros_like(nx_acc)
            ny_acc[...] = jnp.zeros_like(ny_acc)

        def strip(j, mask=None):
            # Strip-wise loads + upcast: widened data lives only in vregs.
            sl = slice(j * 128, (j + 1) * 128)
            xs = s_ref[:, sl].astype(jnp.float32)
            ys = b_ref[:, sl].astype(jnp.float32)
            if mask is not None:
                xs = jnp.where(mask, xs, 0.0)
                ys = jnp.where(mask, ys, 0.0)
            dot_acc[...] += xs * ys
            nx_acc[...] += xs * xs
            ny_acc[...] += ys * ys

        def full_block():
            for j in range(n_strips):
                strip(j)

        def tail_block():
            for j in range(tail_full):
                strip(j)
            if tail_part:
                lane = lax.broadcasted_iota(jnp.int32, (1, 128), 1)
                strip(tail_full, mask=lane < tail_part)
            # Strips past `rem` are out-of-bounds (unspecified) and never read.

        if rem == tk:               # D divides the K tiling: no masking at all
            full_block()
        elif nk == 1:               # single, ragged K block
            tail_block()
        else:
            pl.when(k < nk - 1)(full_block)
            pl.when(k == nk - 1)(tail_block)

        @pl.when(k == nk - 1)
        def _finalize():
            # The only cross-lane reductions: once per row tile.
            dot = jnp.sum(dot_acc[...], axis=-1, keepdims=True)
            nx = jnp.sum(nx_acc[...], axis=-1, keepdims=True)
            ny = jnp.sum(ny_acc[...], axis=-1, keepdims=True)
            # torch.cosine_similarity clamps the product of squared norms:
            #   cos = <x,y> / sqrt(max(|x|^2 * |y|^2, eps^2))
            denom2 = jnp.maximum(nx * ny, EPS * EPS)
            cos = dot * lax.rsqrt(denom2)
            # Lane-dense, write-once output block (unmasked stores).
            o_ref[...] = jnp.broadcast_to(cos, o_ref.shape).astype(o_ref.dtype)

    return kernel


def cosin_net(sample_features_ext, batch_features_ext, *,
              metric_scale=False, metric_scale_param=None):
    """JAX/Pallas equivalent of CosinNet.forward."""
    B = batch_features_ext.shape[0]
    N = batch_features_ext.shape[1]
    BN = B * N

    # Same .view() semantics as the torch module (row-major flatten); the
    # (B, N) leading axes are merged into one row axis.
    s = sample_features_ext.reshape(BN, -1)
    b = batch_features_ext.reshape(BN, -1)
    D = b.shape[-1]
    if s.shape != b.shape:
        raise ValueError("flattened sample/batch features must match")

    tm_cap, tk_cap, vmem_limit = _select_caps()

    # ---- row tiling: no padding (Pallas masks edge-block writes) -----------
    nr = pl.cdiv(BN, tm_cap)
    if BN >= 32:
        nr = max(nr, 2)      # give both v7x TensorCores a row tile to work on
    tm = _round_up(pl.cdiv(BN, nr), 16)
    nr = pl.cdiv(BN, tm)

    # ---- reduction tiling: ragged tail masked in-kernel ---------------------
    nk = pl.cdiv(D, tk_cap)
    tk = _round_up(pl.cdiv(D, nk), 128)
    nk = pl.cdiv(D, tk)

    itemsize = jnp.dtype(s.dtype).itemsize
    cost = pl.CostEstimate(
        flops=6 * BN * D,                      # 3 muls + 3 adds per element
        transcendentals=BN,                    # one rsqrt per row
        bytes_accessed=2 * BN * D * itemsize + BN * _OUT_LANES * 4,
    )

    out = pl.pallas_call(
        _make_kernel(tk, D, nk),
        out_shape=jax.ShapeDtypeStruct((BN, _OUT_LANES), jnp.float32),
        grid=(nr, nk),
        in_specs=[
            pl.BlockSpec((tm, tk), lambda i, k: (i, k)),
            pl.BlockSpec((tm, tk), lambda i, k: (i, k)),
        ],
        out_specs=pl.BlockSpec((tm, _OUT_LANES), lambda i, k: (i, 0)),
        scratch_shapes=[pltpu.VMEM((tm, _OUT_LANES), jnp.float32)] * 3,
        compiler_params=pltpu.CompilerParams(
            dimension_semantics=("parallel", "arbitrary"),
            vmem_limit_bytes=vmem_limit,
        ),
        cost_estimate=cost,
    )(s, b)

    # Column 0 of each lane-broadcast row holds the cosine value.
    cos = out[:, 0].reshape(B, N)
    if metric_scale:
        cos = cos * jnp.asarray(metric_scale_param, jnp.float32)
    return cos


def _reference(sample, batch, scale):
    B, N = batch.shape[0], batch.shape[1]
    x = sample.reshape(B, N, -1).astype(jnp.float32)
    y = batch.reshape(B, N, -1).astype(jnp.float32)
    dot = jnp.sum(x * y, axis=-1)
    denom = jnp.sqrt(jnp.maximum(jnp.sum(x * x, -1) * jnp.sum(y * y, -1),
                                 EPS * EPS))
    return dot / denom * scale


if __name__ == "__main__":
    key = jax.random.PRNGKey(0)
    k1, k2, k3, k4, k5, k6 = jax.random.split(key, 6)

    # --- Case 1: small module-typical shapes (B, N, C, H, W) = (2,4,4,16,16).
    B, N, C, H, W = 2, 4, 4, 16, 16
    sample = jax.random.normal(k1, (B, N, C, H, W), dtype=jnp.float32)
    batch = jax.random.normal(k2, (B, N, C, H, W), dtype=jnp.float32)
    scale_param = jnp.float32(7.0)   # deterministic metric_scale_param value
    out = jax.block_until_ready(
        cosin_net(sample, batch, metric_scale=True,
                  metric_scale_param=scale_param))
    ref = _reference(sample, batch, 7.0)
    assert out.shape == (B, N)
    assert jnp.allclose(out, ref, atol=1e-4, rtol=1e-4)

    # --- Case 2: ragged shapes (BN=10, D=363) exercising row/column tails.
    B2, N2, C2, H2, W2 = 2, 5, 3, 11, 11
    sample2 = jax.random.normal(k3, (B2, N2, C2, H2, W2), dtype=jnp.float32)
    batch2 = jax.random.normal(k4, (B2, N2, C2, H2, W2), dtype=jnp.float32)
    out2 = jax.block_until_ready(cosin_net(sample2, batch2,
                                           metric_scale=False))
    ref2 = _reference(sample2, batch2, 1.0)
    assert out2.shape == (B2, N2)
    assert jnp.allclose(out2, ref2, atol=1e-4, rtol=1e-4)

    # --- Case 3: BN=48 (>=2 row tiles), D=5000 (multi-K grid + masked tail),
    #             bf16 features arriving already in bf16 (no wrapper convert).
    B3, N3, C3, H3, W3 = 4, 12, 8, 25, 25
    sample3 = jax.random.normal(k5, (B3, N3, C3, H3, W3),
                                dtype=jnp.float32).astype(jnp.bfloat16)
    batch3 = jax.random.normal(k6, (B3, N3, C3, H3, W3),
                               dtype=jnp.float32).astype(jnp.bfloat16)
    out3 = jax.block_until_ready(cosin_net(sample3, batch3,
                                           metric_scale=False))
    ref3 = _reference(sample3.astype(jnp.float32),
                      batch3.astype(jnp.float32), 1.0)
    assert out3.shape == (B3, N3)
    assert jnp.allclose(out3, ref3, atol=1e-3, rtol=1e-3)

    print("KERNEL_OK")
</pallas_src>

<mosaic_0001>
module attributes {stable_mosaic.version = 11 : i64} {
  func.func @kernel(%arg0: i32, %arg1: i32, %arg2: memref<16x1024xf32, #tpu.memory_space<vmem>>, %arg3: memref<16x1024xf32, #tpu.memory_space<vmem>>, %arg4: memref<16x128xf32, #tpu.memory_space<vmem>>, %arg5: memref<16x128xf32, #tpu.memory_space<vmem>>, %arg6: memref<16x128xf32, #tpu.memory_space<vmem>>, %arg7: memref<16x128xf32, #tpu.memory_space<vmem>>) attributes {dimension_semantics = [#tpu.dimension_semantics<parallel>, #tpu.dimension_semantics<arbitrary>], iteration_bounds = array<i64: 1, 1>, scalar_prefetch = 0 : i64, scratch_operands = 3 : i64, tpu.core_type = #tpu.core_type<tc>, window_params = [{transform_indices = @transform_0, window_bounds = array<i64: 16, 1024>}, {transform_indices = @transform_1, window_bounds = array<i64: 16, 1024>}, {transform_indices = @transform_2, window_bounds = array<i64: 16, 128>}]} {
    %c0_i32 = arith.constant 0 : i32
    %0 = arith.cmpi eq, %arg1, %c0_i32 : i32
    %1 = arith.extui %0 : i1 to i32
    %c0_i32_0 = arith.constant 0 : i32
    %2 = arith.cmpi ne, %1, %c0_i32_0 : i32
    scf.if %2 {
      %cst = arith.constant 0.000000e+00 : f32
      %118 = vector.broadcast %cst : f32 to vector<16x128xf32>
      %c0_123 = arith.constant 0 : index
      %c0_124 = arith.constant 0 : index
      %119 = vector.load %arg5[%c0_123, %c0_124] : memref<16x128xf32, #tpu.memory_space<vmem>>, vector<16x128xf32>
      tpu.vector_store %arg5[%c0_123, %c0_124], %118 {strides = array<i32>} : memref<16x128xf32, #tpu.memory_space<vmem>>, vector<16x128xf32>,
      %cst_125 = arith.constant 0.000000e+00 : f32
      %120 = vector.broadcast %cst_125 : f32 to vector<16x128xf32>
      %c0_126 = arith.constant 0 : index
      %c0_127 = arith.constant 0 : index
      %121 = vector.load %arg6[%c0_126, %c0_127] : memref<16x128xf32, #tpu.memory_space<vmem>>, vector<16x128xf32>
      tpu.vector_store %arg6[%c0_126, %c0_127], %120 {strides = array<i32>} : memref<16x128xf32, #tpu.memory_space<vmem>>, vector<16x128xf32>,
      %cst_128 = arith.constant 0.000000e+00 : f32
      %122 = vector.broadcast %cst_128 : f32 to vector<16x128xf32>
      %c0_129 = arith.constant 0 : index
      %c0_130 = arith.constant 0 : index
      %123 = vector.load %arg7[%c0_129, %c0_130] : memref<16x128xf32, #tpu.memory_space<vmem>>, vector<16x128xf32>
      tpu.vector_store %arg7[%c0_129, %c0_130], %122 {strides = array<i32>} : memref<16x128xf32, #tpu.memory_space<vmem>>, vector<16x128xf32>,
    } else {
    }
    %c0 = arith.constant 0 : index
    %c0_1 = arith.constant 0 : index
    %3 = vector.load %arg2[%c0, %c0_1] : memref<16x1024xf32, #tpu.memory_space<vmem>>, vector<16x128xf32>
    %c0_2 = arith.constant 0 : index
    %c0_3 = arith.constant 0 : index
    %4 = vector.load %arg3[%c0_2, %c0_3] : memref<16x1024xf32, #tpu.memory_space<vmem>>, vector<16x128xf32>
    %c0_4 = arith.constant 0 : index
    %c0_5 = arith.constant 0 : index
    %5 = vector.load %arg5[%c0_4, %c0_5] : memref<16x128xf32, #tpu.memory_space<vmem>>, vector<16x128xf32>
    %6 = arith.mulf %3, %4 : vector<16x128xf32>
    %7 = arith.addf %5, %6 : vector<16x128xf32>
    %c0_6 = arith.constant 0 : index
    %c0_7 = arith.constant 0 : index
    %8 = vector.load %arg5[%c0_6, %c0_7] : memref<16x128xf32, #tpu.memory_space<vmem>>, vector<16x128xf32>
    tpu.vector_store %arg5[%c0_6, %c0_7], %7 {strides = array<i32>} : memref<16x128xf32, #tpu.memory_space<vmem>>, vector<16x128xf32>,
    %c0_8 = arith.constant 0 : index
    %c0_9 = arith.constant 0 : index
    %9 = vector.load %arg6[%c0_8, %c0_9] : memref<16x128xf32, #tpu.memory_space<vmem>>, vector<16x128xf32>
    %10 = arith.mulf %3, %3 : vector<16x128xf32>
    %11 = arith.addf %9, %10 : vector<16x128xf32>
    %c0_10 = arith.constant 0 : index
    %c0_11 = arith.constant 0 : index
    %12 = vector.load %arg6[%c0_10, %c0_11] : memref<16x128xf32, #tpu.memory_space<vmem>>, vector<16x128xf32>
    tpu.vector_store %arg6[%c0_10, %c0_11], %11 {strides = array<i32>} : memref<16x128xf32, #tpu.memory_space<vmem>>, vector<16x128xf32>,
    %c0_12 = arith.constant 0 : index
    %c0_13 = arith.constant 0 : index
    %13 = vector.load %arg7[%c0_12, %c0_13] : memref<16x128xf32, #tpu.memory_space<vmem>>, vector<16x128xf32>
    %14 = arith.mulf %4, %4 : vector<16x128xf32>
    %15 = arith.addf %13, %14 : vector<16x128xf32>
    %c0_14 = arith.constant 0 : index
    %c0_15 = arith.constant 0 : index
    %16 = vector.load %arg7[%c0_14, %c0_15] : memref<16x128xf32, #tpu.memory_space<vmem>>, vector<16x128xf32>
    tpu.vector_store %arg7[%c0_14, %c0_15], %15 {strides = array<i32>} : memref<16x128xf32, #tpu.memory_space<vmem>>, vector<16x128xf32>,
    %c0_16 = arith.constant 0 : index
    %c128 = arith.constant 128 : index
    %17 = vector.load %arg2[%c0_16, %c128] : memref<16x1024xf32, #tpu.memory_space<vmem>>, vector<16x128xf32>
    %c0_17 = arith.constant 0 : index
    %c128_18 = arith.constant 128 : index
    %18 = vector.load %arg3[%c0_17, %c128_18] : memref<16x1024xf32, #tpu.memory_space<vmem>>, vector<16x128xf32>
    %c0_19 = arith.constant 0 : index
    %c0_20 = arith.constant 0 : index
    %19 = vector.load %arg5[%c0_19, %c0_20] : memref<16x128xf32, #tpu.memory_space<vmem>>, vector<16x128xf32>
    %20 = arith.mulf %17, %18 : vector<16x128xf32>
    %21 = arith.addf %19, %20 : vector<16x128xf32>
    %c0_21 = arith.constant 0 : index
    %c0_22 = arith.constant 0 : index
    %22 = vector.load %arg5[%c0_21, %c0_22] : memref<16x128xf32, #tpu.memory_space<vmem>>, vector<16x128xf32>
    tpu.vector_store %arg5[%c0_21, %c0_22], %21 {strides = array<i32>} : memref<16x128xf32, #tpu.memory_space<vmem>>, vector<16x128xf32>,
    %c0_23 = arith.constant 0 : index
    %c0_24 = arith.constant 0 : index
    %23 = vector.load %arg6[%c0_23, %c0_24] : memref<16x128xf32, #tpu.memory_space<vmem>>, vector<16x128xf32>
    %24 = arith.mulf %17, %17 : vector<16x128xf32>
    %25 = arith.addf %23, %24 : vector<16x128xf32>
    %c0_25 = arith.constant 0 : index
    %c0_26 = arith.constant 0 : index
    %26 = vector.load %arg6[%c0_25, %c0_26] : memref<16x128xf32, #tpu.memory_space<vmem>>, vector<16x128xf32>
    tpu.vector_store %arg6[%c0_25, %c0_26], %25 {strides = array<i32>} : memref<16x128xf32, #tpu.memory_space<vmem>>, vector<16x128xf32>,
    %c0_27 = arith.constant 0 : index
    %c0_28 = arith.constant 0 : index
    %27 = vector.load %arg7[%c0_27, %c0_28] : memref<16x128xf32, #tpu.memory_space<vmem>>, vector<16x128xf32>
    %28 = arith.mulf %18, %18 : vector<16x128xf32>
    %29 = arith.addf %27, %28 : vector<16x128xf32>
    %c0_29 = arith.constant 0 : index
    %c0_30 = arith.constant 0 : index
    %30 = vector.load %arg7[%c0_29, %c0_30] : memref<16x128xf32, #tpu.memory_space<vmem>>, vector<16x128xf32>
    tpu.vector_store %arg7[%c0_29, %c0_30], %29 {strides = array<i32>} : memref<16x128xf32, #tpu.memory_space<vmem>>, vector<16x128xf32>,
    %c0_31 = arith.constant 0 : index
    %c256 = arith.constant 256 : index
    %31 = vector.load %arg2[%c0_31, %c256] : memref<16x1024xf32, #tpu.memory_space<vmem>>, vector<16x128xf32>
    %c0_32 = arith.constant 0 : index
    %c256_33 = arith.constant 256 : index
    %32 = vector.load %arg3[%c0_32, %c256_33] : memref<16x1024xf32, #tpu.memory_space<vmem>>, vector<16x128xf32>
    %c0_34 = arith.constant 0 : index
    %c0_35 = arith.constant 0 : index
    %33 = vector.load %arg5[%c0_34, %c0_35] : memref<16x128xf32, #tpu.memory_space<vmem>>, vector<16x128xf32>
    %34 = arith.mulf %31, %32 : vector<16x128xf32>
    %35 = arith.addf %33, %34 : vector<16x128xf32>
    %c0_36 = arith.constant 0 : index
    %c0_37 = arith.constant 0 : index
    %36 = vector.load %arg5[%c0_36, %c0_37] : memref<16x128xf32, #tpu.memory_space<vmem>>, vector<16x128xf32>
    tpu.vector_store %arg5[%c0_36, %c0_37], %35 {strides = array<i32>} : memref<16x128xf32, #tpu.memory_space<vmem>>, vector<16x128xf32>,
    %c0_38 = arith.constant 0 : index
    %c0_39 = arith.constant 0 : index
    %37 = vector.load %arg6[%c0_38, %c0_39] : memref<16x128xf32, #tpu.memory_space<vmem>>, vector<16x128xf32>
    %38 = arith.mulf %31, %31 : vector<16x128xf32>
    %39 = arith.addf %37, %38 : vector<16x128xf32>
    %c0_40 = arith.constant 0 : index
    %c0_41 = arith.constant 0 : index
    %40 = vector.load %arg6[%c0_40, %c0_41] : memref<16x128xf32, #tpu.memory_space<vmem>>, vector<16x128xf32>
    tpu.vector_store %arg6[%c0_40, %c0_41], %39 {strides = array<i32>} : memref<16x128xf32, #tpu.memory_space<vmem>>, vector<16x128xf32>,
    %c0_42 = arith.constant 0 : index
    %c0_43 = arith.constant 0 : index
    %41 = vector.load %arg7[%c0_42, %c0_43] : memref<16x128xf32, #tpu.memory_space<vmem>>, vector<16x128xf32>
    %42 = arith.mulf %32, %32 : vector<16x128xf32>
    %43 = arith.addf %41, %42 : vector<16x128xf32>
    %c0_44 = arith.constant 0 : index
    %c0_45 = arith.constant 0 : index
    %44 = vector.load %arg7[%c0_44, %c0_45] : memref<16x128xf32, #tpu.memory_space<vmem>>, vector<16x128xf32>
    tpu.vector_store %arg7[%c0_44, %c0_45], %43 {strides = array<i32>} : memref<16x128xf32, #tpu.memory_space<vmem>>, vector<16x128xf32>,
    %c0_46 = arith.constant 0 : index
    %c384 = arith.constant 384 : index
    %45 = vector.load %arg2[%c0_46, %c384] : memref<16x1024xf32, #tpu.memory_space<vmem>>, vector<16x128xf32>
    %c0_47 = arith.constant 0 : index
    %c384_48 = arith.constant 384 : index
    %46 = vector.load %arg3[%c0_47, %c384_48] : memref<16x1024xf32, #tpu.memory_space<vmem>>, vector<16x128xf32>
    %c0_49 = arith.constant 0 : index
    %c0_50 = arith.constant 0 : index
    %47 = vector.load %arg5[%c0_49, %c0_50] : memref<16x128xf32, #tpu.memory_space<vmem>>, vector<16x128xf32>
    %48 = arith.mulf %45, %46 : vector<16x128xf32>
    %49 = arith.addf %47, %48 : vector<16x128xf32>
    %c0_51 = arith.constant 0 : index
    %c0_52 = arith.constant 0 : index
    %50 = vector.load %arg5[%c0_51, %c0_52] : memref<16x128xf32, #tpu.memory_space<vmem>>, vector<16x128xf32>
    tpu.vector_store %arg5[%c0_51, %c0_52], %49 {strides = array<i32>} : memref<16x128xf32, #tpu.memory_space<vmem>>, vector<16x128xf32>,
    %c0_53 = arith.constant 0 : index
    %c0_54 = arith.constant 0 : index
    %51 = vector.load %arg6[%c0_53, %c0_54] : memref<16x128xf32, #tpu.memory_space<vmem>>, vector<16x128xf32>
    %52 = arith.mulf %45, %45 : vector<16x128xf32>
    %53 = arith.addf %51, %52 : vector<16x128xf32>
    %c0_55 = arith.constant 0 : index
    %c0_56 = arith.constant 0 : index
    %54 = vector.load %arg6[%c0_55, %c0_56] : memref<16x128xf32, #tpu.memory_space<vmem>>, vector<16x128xf32>
    tpu.vector_store %arg6[%c0_55, %c0_56], %53 {strides = array<i32>} : memref<16x128xf32, #tpu.memory_space<vmem>>, vector<16x128xf32>,
    %c0_57 = arith.constant 0 : index
    %c0_58 = arith.constant 0 : index
    %55 = vector.load %arg7[%c0_57, %c0_58] : memref<16x128xf32, #tpu.memory_space<vmem>>, vector<16x128xf32>
    %56 = arith.mulf %46, %46 : vector<16x128xf32>
    %57 = arith.addf %55, %56 : vector<16x128xf32>
    %c0_59 = arith.constant 0 : index
    %c0_60 = arith.constant 0 : index
    %58 = vector.load %arg7[%c0_59, %c0_60] : memref<16x128xf32, #tpu.memory_space<vmem>>, vector<16x128xf32>
    tpu.vector_store %arg7[%c0_59, %c0_60], %57 {strides = array<i32>} : memref<16x128xf32, #tpu.memory_space<vmem>>, vector<16x128xf32>,
    %c0_61 = arith.constant 0 : index
    %c512 = arith.constant 512 : index
    %59 = vector.load %arg2[%c0_61, %c512] : memref<16x1024xf32, #tpu.memory_space<vmem>>, vector<16x128xf32>
    %c0_62 = arith.constant 0 : index
    %c512_63 = arith.constant 512 : index
    %60 = vector.load %arg3[%c0_62, %c512_63] : memref<16x1024xf32, #tpu.memory_space<vmem>>, vector<16x128xf32>
    %c0_64 = arith.constant 0 : index
    %c0_65 = arith.constant 0 : index
    %61 = vector.load %arg5[%c0_64, %c0_65] : memref<16x128xf32, #tpu.memory_space<vmem>>, vector<16x128xf32>
    %62 = arith.mulf %59, %60 : vector<16x128xf32>
    %63 = arith.addf %61, %62 : vector<16x128xf32>
    %c0_66 = arith.constant 0 : index
    %c0_67 = arith.constant 0 : index
    %64 = vector.load %arg5[%c0_66, %c0_67] : memref<16x128xf32, #tpu.memory_space<vmem>>, vector<16x128xf32>
    tpu.vector_store %arg5[%c0_66, %c0_67], %63 {strides = array<i32>} : memref<16x128xf32, #tpu.memory_space<vmem>>, vector<16x128xf32>,
    %c0_68 = arith.constant 0 : index
    %c0_69 = arith.constant 0 : index
    %65 = vector.load %arg6[%c0_68, %c0_69] : memref<16x128xf32, #tpu.memory_space<vmem>>, vector<16x128xf32>
    %66 = arith.mulf %59, %59 : vector<16x128xf32>
    %67 = arith.addf %65, %66 : vector<16x128xf32>
    %c0_70 = arith.constant 0 : index
    %c0_71 = arith.constant 0 : index
    %68 = vector.load %arg6[%c0_70, %c0_71] : memref<16x128xf32, #tpu.memory_space<vmem>>, vector<16x128xf32>
    tpu.vector_store %arg6[%c0_70, %c0_71], %67 {strides = array<i32>} : memref<16x128xf32, #tpu.memory_space<vmem>>, vector<16x128xf32>,
    %c0_72 = arith.constant 0 : index
    %c0_73 = arith.constant 0 : index
    %69 = vector.load %arg7[%c0_72, %c0_73] : memref<16x128xf32, #tpu.memory_space<vmem>>, vector<16x128xf32>
    %70 = arith.mulf %60, %60 : vector<16x128xf32>
    %71 = arith.addf %69, %70 : vector<16x128xf32>
    %c0_74 = arith.constant 0 : index
    %c0_75 = arith.constant 0 : index
    %72 = vector.load %arg7[%c0_74, %c0_75] : memref<16x128xf32, #tpu.memory_space<vmem>>, vector<16x128xf32>
    tpu.vector_store %arg7[%c0_74, %c0_75], %71 {strides = array<i32>} : memref<16x128xf32, #tpu.memory_space<vmem>>, vector<16x128xf32>,
    %c0_76 = arith.constant 0 : index
    %c640 = arith.constant 640 : index
    %73 = vector.load %arg2[%c0_76, %c640] : memref<16x1024xf32, #tpu.memory_space<vmem>>, vector<16x128xf32>
    %c0_77 = arith.constant 0 : index
    %c640_78 = arith.constant 640 : index
    %74 = vector.load %arg3[%c0_77, %c640_78] : memref<16x1024xf32, #tpu.memory_space<vmem>>, vector<16x128xf32>
    %c0_79 = arith.constant 0 : index
    %c0_80 = arith.constant 0 : index
    %75 = vector.load %arg5[%c0_79, %c0_80] : memref<16x128xf32, #tpu.memory_space<vmem>>, vector<16x128xf32>
    %76 = arith.mulf %73, %74 : vector<16x128xf32>
    %77 = arith.addf %75, %76 : vector<16x128xf32>
    %c0_81 = arith.constant 0 : index
    %c0_82 = arith.constant 0 : index
    %78 = vector.load %arg5[%c0_81, %c0_82] : memref<16x128xf32, #tpu.memory_space<vmem>>, vector<16x128xf32>
    tpu.vector_store %arg5[%c0_81, %c0_82], %77 {strides = array<i32>} : memref<16x128xf32, #tpu.memory_space<vmem>>, vector<16x128xf32>,
    %c0_83 = arith.constant 0 : index
    %c0_84 = arith.constant 0 : index
    %79 = vector.load %arg6[%c0_83, %c0_84] : memref<16x128xf32, #tpu.memory_space<vmem>>, vector<16x128xf32>
    %80 = arith.mulf %73, %73 : vector<16x128xf32>
    %81 = arith.addf %79, %80 : vector<16x128xf32>
    %c0_85 = arith.constant 0 : index
    %c0_86 = arith.constant 0 : index
    %82 = vector.load %arg6[%c0_85, %c0_86] : memref<16x128xf32, #tpu.memory_space<vmem>>, vector<16x128xf32>
    tpu.vector_store %arg6[%c0_85, %c0_86], %81 {strides = array<i32>} : memref<16x128xf32, #tpu.memory_space<vmem>>, vector<16x128xf32>,
    %c0_87 = arith.constant 0 : index
    %c0_88 = arith.constant 0 : index
    %83 = vector.load %arg7[%c0_87, %c0_88] : memref<16x128xf32, #tpu.memory_space<vmem>>, vector<16x128xf32>
    %84 = arith.mulf %74, %74 : vector<16x128xf32>
    %85 = arith.addf %83, %84 : vector<16x128xf32>
    %c0_89 = arith.constant 0 : index
    %c0_90 = arith.constant 0 : index
    %86 = vector.load %arg7[%c0_89, %c0_90] : memref<16x128xf32, #tpu.memory_space<vmem>>, vector<16x128xf32>
    tpu.vector_store %arg7[%c0_89, %c0_90], %85 {strides = array<i32>} : memref<16x128xf32, #tpu.memory_space<vmem>>, vector<16x128xf32>,
    %c0_91 = arith.constant 0 : index
    %c768 = arith.constant 768 : index
    %87 = vector.load %arg2[%c0_91, %c768] : memref<16x1024xf32, #tpu.memory_space<vmem>>, vector<16x128xf32>
    %c0_92 = arith.constant 0 : index
    %c768_93 = arith.constant 768 : index
    %88 = vector.load %arg3[%c0_92, %c768_93] : memref<16x1024xf32, #tpu.memory_space<vmem>>, vector<16x128xf32>
    %c0_94 = arith.constant 0 : index
    %c0_95 = arith.constant 0 : index
    %89 = vector.load %arg5[%c0_94, %c0_95] : memref<16x128xf32, #tpu.memory_space<vmem>>, vector<16x128xf32>
    %90 = arith.mulf %87, %88 : vector<16x128xf32>
    %91 = arith.addf %89, %90 : vector<16x128xf32>
    %c0_96 = arith.constant 0 : index
    %c0_97 = arith.constant 0 : index
    %92 = vector.load %arg5[%c0_96, %c0_97] : memref<16x128xf32, #tpu.memory_space<vmem>>, vector<16x128xf32>
    tpu.vector_store %arg5[%c0_96, %c0_97], %91 {strides = array<i32>} : memref<16x128xf32, #tpu.memory_space<vmem>>, vector<16x128xf32>,
    %c0_98 = arith.constant 0 : index
    %c0_99 = arith.constant 0 : index
    %93 = vector.load %arg6[%c0_98, %c0_99] : memref<16x128xf32, #tpu.memory_space<vmem>>, vector<16x128xf32>
    %94 = arith.mulf %87, %87 : vector<16x128xf32>
    %95 = arith.addf %93, %94 : vector<16x128xf32>
    %c0_100 = arith.constant 0 : index
    %c0_101 = arith.constant 0 : index
    %96 = vector.load %arg6[%c0_100, %c0_101] : memref<16x128xf32, #tpu.memory_space<vmem>>, vector<16x128xf32>
    tpu.vector_store %arg6[%c0_100, %c0_101], %95 {strides = array<i32>} : memref<16x128xf32, #tpu.memory_space<vmem>>, vector<16x128xf32>,
    %c0_102 = arith.constant 0 : index
    %c0_103 = arith.constant 0 : index
    %97 = vector.load %arg7[%c0_102, %c0_103] : memref<16x128xf32, #tpu.memory_space<vmem>>, vector<16x128xf32>
    %98 = arith.mulf %88, %88 : vector<16x128xf32>
    %99 = arith.addf %97, %98 : vector<16x128xf32>
    %c0_104 = arith.constant 0 : index
    %c0_105 = arith.constant 0 : index
    %100 = vector.load %arg7[%c0_104, %c0_105] : memref<16x128xf32, #tpu.memory_space<vmem>>, vector<16x128xf32>
    tpu.vector_store %arg7[%c0_104, %c0_105], %99 {strides = array<i32>} : memref<16x128xf32, #tpu.memory_space<vmem>>, vector<16x128xf32>,
    %c0_106 = arith.constant 0 : index
    %c896 = arith.constant 896 : index
    %101 = vector.load %arg2[%c0_106, %c896] : memref<16x1024xf32, #tpu.memory_space<vmem>>, vector<16x128xf32>
    %c0_107 = arith.constant 0 : index
    %c896_108 = arith.constant 896 : index
    %102 = vector.load %arg3[%c0_107, %c896_108] : memref<16x1024xf32, #tpu.memory_space<vmem>>, vector<16x128xf32>
    %c0_109 = arith.constant 0 : index
    %c0_110 = arith.constant 0 : index
    %103 = vector.load %arg5[%c0_109, %c0_110] : memref<16x128xf32, #tpu.memory_space<vmem>>, vector<16x128xf32>
    %104 = arith.mulf %101, %102 : vector<16x128xf32>
    %105 = arith.addf %103, %104 : vector<16x128xf32>
    %c0_111 = arith.constant 0 : index
    %c0_112 = arith.constant 0 : index
    %106 = vector.load %arg5[%c0_111, %c0_112] : memref<16x128xf32, #tpu.memory_space<vmem>>, vector<16x128xf32>
    tpu.vector_store %arg5[%c0_111, %c0_112], %105 {strides = array<i32>} : memref<16x128xf32, #tpu.memory_space<vmem>>, vector<16x128xf32>,
    %c0_113 = arith.constant 0 : index
    %c0_114 = arith.constant 0 : index
    %107 = vector.load %arg6[%c0_113, %c0_114] : memref<16x128xf32, #tpu.memory_space<vmem>>, vector<16x128xf32>
    %108 = arith.mulf %101, %101 : vector<16x128xf32>
    %109 = arith.addf %107, %108 : vector<16x128xf32>
    %c0_115 = arith.constant 0 : index
    %c0_116 = arith.constant 0 : index
    %110 = vector.load %arg6[%c0_115, %c0_116] : memref<16x128xf32, #tpu.memory_space<vmem>>, vector<16x128xf32>
    tpu.vector_store %arg6[%c0_115, %c0_116], %109 {strides = array<i32>} : memref<16x128xf32, #tpu.memory_space<vmem>>, vector<16x128xf32>,
    %c0_117 = arith.constant 0 : index
    %c0_118 = arith.constant 0 : index
    %111 = vector.load %arg7[%c0_117, %c0_118] : memref<16x128xf32, #tpu.memory_space<vmem>>, vector<16x128xf32>
    %112 = arith.mulf %102, %102 : vector<16x128xf32>
    %113 = arith.addf %111, %112 : vector<16x128xf32>
    %c0_119 = arith.constant 0 : index
    %c0_120 = arith.constant 0 : index
    %114 = vector.load %arg7[%c0_119, %c0_120] : memref<16x128xf32, #tpu.memory_space<vmem>>, vector<16x128xf32>
    tpu.vector_store %arg7[%c0_119, %c0_120], %113 {strides = array<i32>} : memref<16x128xf32, #tpu.memory_space<vmem>>, vector<16x128xf32>,
    %c0_i32_121 = arith.constant 0 : i32
    %115 = arith.cmpi eq, %arg1, %c0_i32_121 : i32
    %116 = arith.extui %115 : i1 to i32
    %c0_i32_122 = arith.constant 0 : i32
    %117 = arith.cmpi ne, %116, %c0_i32_122 : i32
    scf.if %117 {
      %c0_123 = arith.constant 0 : index
      %c0_124 = arith.constant 0 : index
      %118 = vector.load %arg5[%c0_123, %c0_124] : memref<16x128xf32, #tpu.memory_space<vmem>>, vector<16x128xf32>
      %cst = arith.constant dense<0.000000e+00> : vector<16xf32>
      %119 = vector.multi_reduction <add>, %118, %cst [1] : vector<16x128xf32> to vector<16xf32>
      %120 = vector.shape_cast %119 : vector<16xf32> to vector<16x1xf32>
      %c0_125 = arith.constant 0 : index
      %c0_126 = arith.constant 0 : index
      %121 = vector.load %arg6[%c0_125, %c0_126] : memref<16x128xf32, #tpu.memory_space<vmem>>, vector<16x128xf32>
      %cst_127 = arith.constant dense<0.000000e+00> : vector<16xf32>
      %122 = vector.multi_reduction <add>, %121, %cst_127 [1] : vector<16x128xf32> to vector<16xf32>
      %123 = vector.shape_cast %122 : vector<16xf32> to vector<16x1xf32>
      %c0_128 = arith.constant 0 : index
      %c0_129 = arith.constant 0 : index
      %124 = vector.load %arg7[%c0_128, %c0_129] : memref<16x128xf32, #tpu.memory_space<vmem>>, vector<16x128xf32>
      %cst_130 = arith.constant dense<0.000000e+00> : vector<16xf32>
      %125 = vector.multi_reduction <add>, %124, %cst_130 [1] : vector<16x128xf32> to vector<16xf32>
      %126 = vector.shape_cast %125 : vector<16xf32> to vector<16x1xf32>
      %127 = arith.mulf %123, %126 : vector<16x1xf32>
      %cst_131 = arith.constant 1.000000e-16 : f32
      %128 = vector.broadcast %cst_131 : f32 to vector<16x1xf32>
      %129 = arith.maximumf %127, %128 : vector<16x1xf32>
      %130 = math.rsqrt %129 : vector<16x1xf32>
      %131 = arith.mulf %120, %130 : vector<16x1xf32>
      %132 = vector.shape_cast %131 : vector<16x1xf32> to vector<16x1xf32>
      %133 = vector.broadcast %132 : vector<16x1xf32> to vector<16x128xf32>
      %c0_132 = arith.constant 0 : index
      %c0_133 = arith.constant 0 : index
      %134 = vector.load %arg4[%c0_132, %c0_133] : memref<16x128xf32, #tpu.memory_space<vmem>>, vector<16x128xf32>
      tpu.vector_store %arg4[%c0_132, %c0_133], %133 {strides = array<i32>} : memref<16x128xf32, #tpu.memory_space<vmem>>, vector<16x128xf32>,
    } else {
    }
    return
  }
  func.func @transform_0(%arg0: i32, %arg1: i32) -> (i32, i32) {
    %c0_i32 = arith.constant 0 : i32
    return %arg0, %arg1 : i32, i32
  }
  func.func @transform_1(%arg0: i32, %arg1: i32) -> (i32, i32) {
    %c0_i32 = arith.constant 0 : i32
    return %arg0, %arg1 : i32, i32
  }
  func.func @transform_2(%arg0: i32, %arg1: i32) -> (i32, i32) {
    %c0_i32 = arith.constant 0 : i32
    %c0_i32_0 = arith.constant 0 : i32
    return %arg0, %c0_i32 : i32, i32
  }
}

</mosaic_0001>

<bundles_post_ra>
// kernel: tpu_custom_call.1
= control target key start
LH: loop header
LB: loop body
LE: loop exit
PB: predicated region body
PF: predicated region fallthrough
CT: control target
= control target key end

     0   :  { %7 = vsyncpa [#allocation6], 0  ;;  %s559_s0 = inlined_call_operand.hbm [shape: f32[8,1024], index: 0, kind: input, shape index: {}]   ;;  %s560_s1 = inlined_call_operand.hbm [shape: f32[8,1024], index: 1, kind: input, shape index: {}]   ;;  %s561_s2 = inlined_call_operand.hbm [shape: f32[8,128], index: 2, kind: output, shape index: {}]  }
   0x1   :  { %8 = vsyncpa [#allocation9], 0 }
   0x2   :  { %9 = vsyncpa [#allocation7], 0 }
   0x3   :  { %14 = vsyncadd [#allocation6], 1024  ;;  %s406_s9 = smov [#allocation5]   ;;  %s334_s13 = scalar_lea.hbm %s559_s0, 1024 }
   0x4   :  { %s15_s10 = sshll.u32 %s406_s9, 4  ;;  %p335_p0 = scmp.ne.s32.totalorder %s559_s0, %s334_s13  ;;  %s16_s10 = int_to_ptr.vmem [resolvable:$true] %s15_s10 }
   0x5   :  { %p338_p1 = scmp.lt.u32.totalorder %s334_s13, %s559_s0 }
   0x7   :  { %p340_p2 = pnand %p338_p1, %p335_p0 }
   0x9   :  { %343 = shalt.err (!%p340_p2)
}
   0xa   :  { %s344_s18 = scalar_lea.vmem %s16_s10, 1024  ;;  %s348_s19 = scalar_lea.vmem %s16_s10, 2048 }
   0xb   :  { %p345_p3 = scmp.ne.s32.totalorder %s16_s10, %s344_s18  ;;  %p349_p4 = scmp.lt.s32.totalorder %s16_s10, %s16_s10 }
   0xc   :  { %p350_p5 = scmp.lt.s32.totalorder %s348_s19, %s344_s18 }
   0xe   :  { %p351_p6 = por %p350_p5, %p349_p4 }
  0x10   :  { %p352_p7 = pnand %p351_p6, %p345_p3 }
  0x12   :  { %355 = shalt.err (!%p352_p7)
}
  0x13   :  { %s407_s20 = smov 1024   ;;  %s408_s21 = smov 64  }
  0x14   :  { %21 = dma.hbm_to_vmem [thread:$0]  %s559_s0, 1024, %s16_s10, [#allocation6], %s407_s20, %s407_s20, %s408_s21  }
  0x15   :  { %26 = vsyncadd [#allocation9], 1024  ;;  %s409_s24 = smov [#allocation8]   ;;  %s356_s28 = scalar_lea.hbm %s560_s1, 1024 }
  0x16   :  { %s27_s25 = sshll.u32 %s409_s24, 4  ;;  %p357_p8 = scmp.ne.s32.totalorder %s560_s1, %s356_s28  ;;  %s28_s25 = int_to_ptr.vmem [resolvable:$true] %s27_s25 }
  0x17   :  { %p360_p9 = scmp.lt.u32.totalorder %s356_s28, %s560_s1 }
  0x19   :  { %p362_p10 = pnand %p360_p9, %p357_p8 }
  0x1b   :  { %365 = shalt.err (!%p362_p10)
}
  0x1c   :  { %s366_s5 = scalar_lea.vmem %s28_s25, 1024  ;;  %s370_s0 = scalar_lea.vmem %s28_s25, 2048 }
  0x1d   :  { %p367_p11 = scmp.ne.s32.totalorder %s28_s25, %s366_s5  ;;  %p371_p12 = scmp.lt.s32.totalorder %s28_s25, %s28_s25 }
  0x1e   :  { %p372_p13 = scmp.lt.s32.totalorder %s370_s0, %s366_s5 }
  0x20   :  { %p373_p0 = por %p372_p13, %p371_p12 }
  0x22   :  { %p374_p1 = pnand %p373_p0, %p367_p11 }
  0x24   :  { %377 = shalt.err (!%p374_p1)
}
  0x25   :  { %33 = dma.hbm_to_vmem [thread:$0]  %s560_s1, 1024, %s28_s25, [#allocation9], %s407_s20, %s407_s20, %s408_s21  }
  0x26   :  { %400 = dma.done.wait [#allocation6], 2048  }
  0x27   :  { %401 = vsyncadd [#allocation6], 4294965248 }
  0x28   :  { %402 = dma.done.wait [#allocation9], 2048  }
  0x29   :  { %403 = vsyncadd [#allocation9], 4294965248  ;;  %v52_v0 = vld [vmem:[#allocation8] sm:$0xff]  ;;  %v452_v1 = vld [vmem:[#allocation8 + $0x8] sm:$0xff] }
  0x2a   :  { %v454_v2 = vld [vmem:[#allocation8 + $0x10] sm:$0xff]  ;;  %v72_v3 = vmul.f32 %v52_v0, %v52_v0  ;;  %v100_v4 = vmul.f32 %v452_v1, %v452_v1  ;;  %v460_v6 = vld [vmem:[#allocation8 + $0x18] sm:$0xff]  ;;  %v462_v7 = vld [vmem:[#allocation8 + $0x20] sm:$0xff] }
  0x2b   :  { %v128_v5 = vmul.f32 %v454_v2, %v454_v2  ;;  %v464_v8 = vld [vmem:[#allocation8 + $0x28] sm:$0xff]  ;;  %v466_v9 = vld [vmem:[#allocation8 + $0x30] sm:$0xff]  ;;  %v468_v10 = vld [vmem:[#allocation8 + $0x38] sm:$0xff]  ;;  %v156_v13 = vmul.f32 %v460_v6, %v460_v6  ;;  %v184_v14 = vmul.f32 %v462_v7, %v462_v7 }
  0x2c   :  { %v50_v11 = vld [vmem:[#allocation5] sm:$0xff]  ;;  %v102_v12 = vadd.f32 %v100_v4, %v72_v3  ;;  %v78_v16 = vld [vmem:[#allocation5 + $0x8] sm:$0xff]  ;;  %v106_v17 = vld [vmem:[#allocation5 + $0x10] sm:$0xff]  ;;  %v212_v19 = vmul.f32 %v464_v8, %v464_v8  ;;  %v240_v20 = vmul.f32 %v466_v9, %v466_v9  ;;  %v268_v27 = vmul.f32 %v468_v10, %v468_v10 }
  0x2d   :  { %v64_v15 = vmul.f32 %v50_v11, %v50_v11  ;;  %v474_v18 = vld [vmem:[#allocation5 + $0x18] sm:$0xff]  ;;  %v92_v21 = vmul.f32 %v78_v16, %v78_v16  ;;  %v120_v22 = vmul.f32 %v106_v17, %v106_v17  ;;  %v480_v23 = vld [vmem:[#allocation5 + $0x20] sm:$0xff]  ;;  %v482_v24 = vld [vmem:[#allocation5 + $0x28] sm:$0xff]  ;;  %v56_v32 = vmul.f32 %v52_v0, %v50_v11 }
  0x2e   :  { %v484_v25 = vld [vmem:[#allocation5 + $0x30] sm:$0xff]  ;;  %v130_v26 = vadd.f32 %v128_v5, %v102_v12  ;;  %v148_v28 = vmul.f32 %v474_v18, %v474_v18  ;;  %v490_v29 = vld [vmem:[#allocation5 + $0x38] sm:$0xff]  ;;  %v492_v30 = vld [vmem:[#allocation8 + $0x40] sm:$0xff]  ;;  %v176_v34 = vmul.f32 %v480_v23, %v480_v23  ;;  %v204_v41 = vmul.f32 %v482_v24, %v482_v24 }
  0x2f   :  { %v494_v31 = vld [vmem:[#allocation8 + $0x48] sm:$0xff]  ;;  %v94_v33 = vadd.f32 %v92_v21, %v64_v15  ;;  %v73_v35 = vmul.f32 %v492_v30, %v492_v30  ;;  %v109_v37 = vld [vmem:[#allocation8 + $0x50] sm:$0xff]  ;;  %v502_v38 = vld [vmem:[#allocation8 + $0x58] sm:$0xff]  ;;  %v232_v42 = vmul.f32 %v484_v25, %v484_v25  ;;  %v260_v47 = vmul.f32 %v490_v29, %v490_v29 }
  0x30   :  { %v101_v36 = vmul.f32 %v494_v31, %v494_v31  ;;  %v504_v39 = vld [vmem:[#allocation8 + $0x60] sm:$0xff]  ;;  %v158_v40 = vadd.f32 %v156_v13, %v130_v26  ;;  %v129_v43 = vmul.f32 %v109_v37, %v109_v37  ;;  %v510_v44 = vld [vmem:[#allocation8 + $0x68] sm:$0xff]  ;;  %v512_v45 = vld [vmem:[#allocation8 + $0x70] sm:$0xff]  ;;  %v157_v49 = vmul.f32 %v502_v38, %v502_v38 }
  0x31   :  { %v122_v46 = vadd.f32 %v120_v22, %v94_v33  ;;  %v51_v50 = vld [vmem:[#allocation5 + $0x40] sm:$0xff]  ;;  %v79_v51 = vld [vmem:[#allocation5 + $0x48] sm:$0xff]  ;;  %v107_v52 = vld [vmem:[#allocation5 + $0x50] sm:$0xff]  ;;  %v185_v54 = vmul.f32 %v504_v39, %v504_v39  ;;  %v213_v62 = vmul.f32 %v510_v44, %v510_v44  ;;  %v241_v3 = vmul.f32 %v512_v45, %v512_v45 }
  0x32   :  { %v103_v48 = vadd.f32 %v101_v36, %v73_v35  ;;  %v186_v53 = vadd.f32 %v184_v14, %v158_v40  ;;  %v520_v55 = vld [vmem:[#allocation8 + $0x78] sm:$0xff]  ;;  %v65_v56 = vmul.f32 %v51_v50, %v51_v50  ;;  %v93_v57 = vmul.f32 %v79_v51, %v79_v51  ;;  %v163_v59 = vld [vmem:[#allocation5 + $0x60] sm:$0xff]  ;;  %v191_v11 = vld [vmem:[#allocation5 + $0x68] sm:$0xff] }
  0x33   :  { %v135_v58 = vld [vmem:[#allocation5 + $0x58] sm:$0xff]  ;;  %v150_v60 = vadd.f32 %v148_v28, %v122_v46  ;;  %v121_v63 = vmul.f32 %v107_v52, %v107_v52  ;;  %v219_v12 = vld [vmem:[#allocation5 + $0x70] sm:$0xff]  ;;  %v269_v15 = vmul.f32 %v520_v55, %v520_v55  ;;  %v177_v21 = vmul.f32 %v163_v59, %v163_v59 }
  0x34   :  { %v131_v61 = vadd.f32 %v129_v43, %v103_v48  ;;  %v214_v0 = vadd.f32 %v212_v19, %v186_v53  ;;  %v95_v4 = vadd.f32 %v93_v57, %v65_v56  ;;  %v149_v5 = vmul.f32 %v135_v58, %v135_v58  ;;  %v247_v28 = vld [vmem:[#allocation5 + $0x78] sm:$0xff] }
  0x35   :  { %v178_v13 = vadd.f32 %v176_v34, %v150_v60  ;;  %v84_v33 = vmul.f32 %v452_v1, %v78_v16  ;;  %v112_v19 = vmul.f32 %v454_v2, %v106_v17  ;;  %v205_v40 = vmul.f32 %v191_v11, %v191_v11 }
  0x36   :  { %v159_v14 = vadd.f32 %v157_v49, %v131_v61  ;;  %v242_v22 = vadd.f32 %v240_v20, %v214_v0  ;;  %v123_v26 = vadd.f32 %v121_v63, %v95_v4  ;;  %v233_v43 = vmul.f32 %v219_v12, %v219_v12 }
  0x37   :  { %v206_v35 = vadd.f32 %v204_v41, %v178_v13  ;;  %v86_v53 = vadd.f32 %v84_v33, %v56_v32  ;;  %v140_v34 = vmul.f32 %v460_v6, %v474_v18  ;;  %v261_v57 = vmul.f32 %v247_v28, %v247_v28 }
  0x38   :  { %v187_v36 = vadd.f32 %v185_v54, %v159_v14  ;;  %v270_v46 = vadd.f32 %v268_v27, %v242_v22  ;;  %v151_v48 = vadd.f32 %v149_v5, %v123_v26  ;;  %v168_v20 = vmul.f32 %v462_v7, %v480_v23 }
  0x39   :  { %v234_v49 = vadd.f32 %v232_v42, %v206_v35  ;;  %v114_v16 = vadd.f32 %v112_v19, %v86_v53  ;;  %v57_v2 = vmul.f32 %v492_v30, %v51_v50  ;;  %v85_v17 = vmul.f32 %v494_v31, %v79_v51 }
  0x3a   :  { %v215_v56 = vadd.f32 %v213_v62, %v187_v36  ;;  %291 = vadd.xlane.f32.xlu1 %v270_v46  ;;  %v179_v1 = vadd.f32 %v177_v21, %v151_v48  ;;  %v196_v32 = vmul.f32 %v464_v8, %v482_v24  ;;  %v113_v54 = vmul.f32 %v109_v37, %v107_v52 }
  0x3b   :  { %v262_v41 = vadd.f32 %v260_v47, %v234_v49  ;;  %v142_v18 = vadd.f32 %v140_v34, %v114_v16  ;;  %v87_v42 = vadd.f32 %v85_v17, %v57_v2  ;;  %v141_v60 = vmul.f32 %v502_v38, %v135_v58 }
  0x3c   :  { %v243_v27 = vadd.f32 %v241_v3, %v215_v56  ;;  %v207_v6 = vadd.f32 %v205_v40, %v179_v1  ;;  %v224_v23 = vmul.f32 %v466_v9, %v484_v25  ;;  %v169_v31 = vmul.f32 %v504_v39, %v163_v59 }
  0x3d   :  { %285 = vadd.xlane.f32.xlu0 %v262_v41  ;;  %v170_v30 = vadd.f32 %v168_v20, %v142_v18  ;;  %v115_v50 = vadd.f32 %v113_v54, %v87_v42  ;;  %v252_v8 = vmul.f32 %v468_v10, %v490_v29  ;;  %v197_v51 = vmul.f32 %v510_v44, %v191_v11 }
  0x3e   :  { %v271_v7 = vadd.f32 %v269_v15, %v243_v27  ;;  %v235_v61 = vadd.f32 %v233_v43, %v207_v6  ;;  %v225_v58 = vmul.f32 %v512_v45, %v219_v12  ;;  %v253_v62 = vmul.f32 %v520_v55, %v247_v28 }
  0x3f   :  { %v198_v37 = vadd.f32 %v196_v32, %v170_v30  ;;  %v143_v47 = vadd.f32 %v141_v60, %v115_v50 }
  0x40   :  { %293 = vadd.xlane.f32.xlu1 %v271_v7  ;;  %v263_v24 = vadd.f32 %v261_v57, %v235_v61 }
  0x41   :  { %v226_v38 = vadd.f32 %v224_v23, %v198_v37  ;;  %v171_v52 = vadd.f32 %v169_v31, %v143_v47 }
  0x42   :  { %287 = vadd.xlane.f32.xlu0 %v263_v24 }
  0x43   :  { %v254_v9 = vadd.f32 %v252_v8, %v226_v38  ;;  %v199_v25 = vadd.f32 %v197_v51, %v171_v52 }
  0x45   :  { %v227_v39 = vadd.f32 %v225_v58, %v199_v25 }
  0x46   :  { %279 = vadd.xlane.f32.xlu0 %v254_v9 }
  0x47   :  { %v255_v59 = vadd.f32 %v253_v62, %v227_v39 }
  0x49   :  { %281 = vadd.xlane.f32.xlu1 %v255_v59 }
  0xc7   :  { %v292_v63 = vpop.xlane.xlu1 %291 }
  0xca   :  { %v286_v10 = vpop.xlane.xlu0 %285 }
  0xcb   :  { %v295_v29 = vmul.f32 %v292_v63, %v286_v10 }
  0xcd   :  { %v297_v0 = vmax.f32 %v295_v29, 1e-16  ;;  %v294_v3 = vpop.xlane.xlu1 %293 }
  0xcf   :  { %330 = vrsqrt.f32 %v297_v0  ;;  %v288_v44 = vpop.xlane.xlu0 %287 }
  0xd0   :  { %v296_v4 = vmul.f32 %v294_v3, %v288_v44 }
  0xd2   :  { %v298_v5 = vmax.f32 %v296_v4, 1e-16 }
  0xd3   :  { %v280_v11 = vpop.xlane.xlu0 %279 }
  0xd4   :  { %332 = vrsqrt.f32 %v298_v5 }
  0xd6   :  { %v282_v13 = vpop.xlane.xlu1 %281 }
  0xd9   :  { %v331_v45 = vpop.eup %330 }
  0xda   :  { %v301_v12 = vmul.f32 %v331_v45, %v280_v11 }
  0xdc   :  { %303 = vst [vmem:[#allocation10] sm:$0xff] %v301_v12 }
  0xde   :  { %v333_v55 = vpop.eup %332 }
  0xdf   :  { %v302_v14 = vmul.f32 %v333_v55, %v282_v13 }
  0xe1   :  { %304 = vst [vmem:[#allocation10 + $0x8] sm:$0xff] %v302_v14 }
  0xe2   :  { %309 = vsyncadd [#allocation7], 128  ;;  %s410_s1 = smov [#allocation10]  }
  0xe3   :  { %s310_s8 = sshll.u32 %s410_s1, 4  ;;  %s311_s8 = int_to_ptr.vmem [resolvable:$true] %s310_s8 }
  0xe4   :  { %s378_s9 = scalar_lea.vmem %s311_s8, 128  ;;  %s382_s10 = scalar_lea.vmem %s311_s8, 256 }
  0xe5   :  { %p379_p2 = scmp.ne.s32.totalorder %s311_s8, %s378_s9  ;;  %p383_p3 = scmp.lt.s32.totalorder %s311_s8, %s311_s8 }
  0xe6   :  { %p384_p4 = scmp.lt.s32.totalorder %s382_s10, %s378_s9 }
  0xe8   :  { %p385_p5 = por %p384_p4, %p383_p3 }
  0xea   :  { %p386_p6 = pnand %p385_p5, %p379_p2 }
  0xec   :  { %389 = shalt.err (!%p386_p6)
}
  0xed   :  { %s390_s13 = scalar_lea.hbm %s561_s2, 128 }
  0xee   :  { %p391_p7 = scmp.ne.s32.totalorder %s561_s2, %s390_s13  ;;  %p394_p8 = scmp.lt.u32.totalorder %s390_s13, %s561_s2 }
  0xf0   :  { %p396_p9 = pnand %p394_p8, %p391_p7 }
  0xf2   :  { %399 = shalt.err (!%p396_p9)
}
  0xf3   :  { %s411_s18 = smov 128   ;;  %s412_s19 = smov 8  }
  0xf4   :  { %316 = dma.vmem_to_hbm [thread:$0]  %s311_s8, 128, %s561_s2, [#allocation7], %s411_s18, %s411_s18, %s412_s19  }
  0xf5   :  { %404 = dma.done.wait [#allocation7], 256  }
  0xf6   :  { %405 = vsyncadd [#allocation7], 4294967040 }
  0xf7   :  { %320 = vsyncpa [#allocation6], 1 }
  0xf8   :  { %321 = vsyncpa [#allocation9], 1 }
  0xf9   :  { %322 = vsyncpa [#allocation7], 1 }

</bundles_post_ra>
